<compile_context>
chip_gen: v5e
topology: v5e:2x2
jax: 0.10.0
libtpu: 0.0.40
codegen_flags: <defaults>
</compile_context>

<pallas_src>
import jax
import jax.numpy as jnp
from jax.experimental import pallas as pl
from jax.experimental.pallas import tpu as pltpu


def _mhap_kernel(hs_ref, wk_eff_ref, wv_ref, mt_ref, wo_ref, bo_eff_ref, out_ref):
    # hs_ref:     (Bt, S, E)  batch tile of hidden_states
    # wk_eff_ref: (E, H)      effective key weight (query, 1/sqrt(dh), head mask folded)
    # wv_ref:     (E, E)      transposed value weight (x @ Wv^T)
    # mt_ref:     (H, E)      one-hot head -> feature selector
    # wo_ref:     (E, E)      transposed output-projection weight
    # bo_eff_ref: (1, E)      bv @ Wo^T + bo
    # out_ref:    (Bt, E)
    bt, s, e = hs_ref.shape
    h = wk_eff_ref.shape[1]

    hs = hs_ref[...]
    hs2 = hs.reshape(bt * s, e)                       # flatten batch tile for the MXU

    # Per-head attention logits directly from hidden states.  The query, the
    # 1/sqrt(dh) scale and the head one-hot are folded into wk_eff; the key
    # bias is dropped because softmax over S is shift-invariant.
    scores = jnp.dot(hs2, wk_eff_ref[...],
                     preferred_element_type=jnp.float32).reshape(bt, s, h)

    # Softmax over the sequence (middle) axis, in f32.
    mx = jnp.max(scores, axis=1, keepdims=True)                  # (Bt, 1, H)
    ex = jnp.exp(scores - mx)                                    # (Bt, S, H)
    denom = jnp.sum(ex, axis=1, keepdims=True)                   # (Bt, 1, H)
    attn = ex * pl.reciprocal(denom, approx=False)               # (Bt, S, H)

    # Pool FIRST (collapse S against the raw hidden states), THEN project.
    ctx = jnp.einsum('bsh,bse->bhe', attn, hs,
                     preferred_element_type=jnp.float32)         # (Bt, H, E)

    # Value projection of the pooled per-head context; pick each head's own
    # dh-column block via the one-hot mask (pooled[b, j] uses head(j)'s row).
    full = jnp.dot(ctx.reshape(bt * h, e), wv_ref[...],
                   preferred_element_type=jnp.float32).reshape(bt, h, e)
    pooled = jnp.sum(full * mt_ref[...], axis=1)                 # (Bt, E)

    out_ref[...] = (jnp.dot(pooled, wo_ref[...],
                            preferred_element_type=jnp.float32)
                    + bo_eff_ref[...])                           # (Bt, E)


def _step_vmem_bytes(bt, S, E, H):
    """Approximate per-grid-step f32 VMEM footprint, incl. in-kernel temporaries."""
    weights = E * H + 2 * E * E + H * E + E
    io = 2 * bt * S * E + 2 * bt * E                    # double-buffered hs in / out tiles
    temps = 3 * bt * S * H + 3 * bt * H * E + bt * E    # scores/exp/attn + ctx/full/pooled
    return 4 * (weights + io + temps)


def _choose_block_batch(B, S, E, H, vmem_budget_bytes=48 * 1024 * 1024,
                        target_rows=512):
    """Batch elements per grid step (Bt).

    Constraints / preferences:
      * Bt divides B and is a multiple of 8 (or equal to B) so the (Bt, E)
        output block stays sublane-dense / legal.
      * Per-step working set (incl. f32 temporaries) fits the VMEM budget
        (capped well under v7x's 64 MiB physical VMEM per TensorCore).
      * Prefer an even grid length >= 2 so both v7x TensorCores get work.
      * Otherwise prefer the largest tile not wildly past ~target_rows
        flattened rows (keeps the MXU M dimension filled without waste).
    """
    divisors = [d for d in range(1, B + 1) if B % d == 0]
    legal = [d for d in divisors if d % 8 == 0 or d == B] or divisors
    fitting = [d for d in legal
               if _step_vmem_bytes(d, S, E, H) <= vmem_budget_bytes]
    if not fitting:
        fitting = [min(legal)]
    desired = max(1, -(-target_rows // S))              # ceil(target_rows / S)
    smallest = min(fitting)

    def score(d):
        steps = B // d
        balanced = (steps >= 2) and (steps % 2 == 0)    # megacore-friendly grid
        not_oversized = (d <= desired) or (d == smallest)
        return (balanced, not_oversized, d)

    return max(fitting, key=score)


def multihead_attention_pooling(hidden_states, params, num_heads):
    """hidden_states: (B, S, E) float32 -> (B, E) float32."""
    B, S, E = hidden_states.shape
    H = num_heads
    dh = E // H
    assert dh * H == E

    f32 = jnp.float32
    w = params["in_proj_weight"].astype(f32)          # (3E, E)
    b = params["in_proj_bias"].astype(f32)            # (3E,)
    wo_t = params["out_proj_weight"].astype(f32).T    # (E, E): x @ Wo^T
    bo = params["out_proj_bias"].astype(f32).reshape(1, E)
    cls = params["cls_token"].astype(f32).reshape(1, E)

    wq_t = w[:E].T
    wk_t = w[E:2 * E].T
    wv_t = w[2 * E:].T
    bq = b[:E].reshape(1, E)
    bv = b[2 * E:].reshape(1, E)
    # NOTE: bk is intentionally dropped — it only adds a per-(b,h) constant to
    # the logits, which softmax shift-invariance cancels exactly.

    # Batch-independent query, head one-hot, and fold query / scale / head
    # mask into a single effective key projection of width H.
    scale = 1.0 / (dh ** 0.5)
    q = cls @ wq_t + bq                                               # (1, E)
    head_id = jnp.arange(E) // dh
    M = (head_id[:, None] == jnp.arange(H)[None, :]).astype(f32)      # (E, H)
    Mt = M.T                                                          # (H, E)
    wk_eff = ((wk_t * q) @ M) * scale                                 # (E, H)

    # Attention weights sum to 1 over S, so the per-token value bias is a
    # single +bv on the pooled vector; fold it through Wo into bo.
    bo_eff = bv @ wo_t + bo                                           # (1, E)

    Bt = _choose_block_batch(B, S, E, H)
    assert B % Bt == 0
    grid = (B // Bt,)

    def _const_spec(shape):
        zeros = (0,) * len(shape)
        return pl.BlockSpec(shape, lambda i, z=zeros: z)

    grid_spec = pltpu.PrefetchScalarGridSpec(
        num_scalar_prefetch=0,
        grid=grid,
        in_specs=[
            pl.BlockSpec((Bt, S, E), lambda i: (i, 0, 0)),   # hidden_states tile
            _const_spec((E, H)),                             # wk_eff
            _const_spec((E, E)),                             # wv_t
            _const_spec((H, E)),                             # Mt
            _const_spec((E, E)),                             # wo_t
            _const_spec((1, E)),                             # bo_eff
        ],
        out_specs=pl.BlockSpec((Bt, E), lambda i: (i, 0)),
    )

    # Advisory cost estimate for XLA scheduling (pool-first FLOP count).
    flops = (2 * B * S * E * H          # attention logits
             + 2 * B * S * H * E        # pooling contraction over S
             + 2 * B * H * E * E        # value projection of pooled context
             + 2 * B * E * E            # output projection
             + 3 * B * H * E)           # mask multiply + head reduction
    bytes_accessed = 4 * (B * S * E + E * H + E * E + H * E + E * E + E + B * E)
    cost = pl.CostEstimate(flops=flops, transcendentals=B * S * H,
                           bytes_accessed=bytes_accessed)

    # Explicit VMEM budget: per-step working set incl. temporaries + headroom,
    # capped at 48 MiB so v7x's 64 MiB per-TC VMEM keeps slack.
    per_step = _step_vmem_bytes(Bt, S, E, H)
    vmem_limit = int(min(48 * 1024 * 1024,
                         max(16 * 1024 * 1024, int(1.5 * per_step))))

    return pl.pallas_call(
        _mhap_kernel,
        out_shape=jax.ShapeDtypeStruct((B, E), jnp.float32),
        grid_spec=grid_spec,
        compiler_params=pltpu.CompilerParams(
            dimension_semantics=("parallel",),
            vmem_limit_bytes=vmem_limit,
        ),
        cost_estimate=cost,
    )(hidden_states.astype(f32), wk_eff, wv_t, Mt, wo_t, bo_eff)


def _reference(hidden_states, params, num_heads):
    """Pure-JAX reference of the PyTorch MultiheadAttention pooling forward."""
    B, S, E = hidden_states.shape
    H = num_heads
    dh = E // H
    w, b = params["in_proj_weight"], params["in_proj_bias"]
    cls = jnp.broadcast_to(params["cls_token"], (B, 1, E))
    q = cls @ w[:E].T + b[:E]
    k = hidden_states @ w[E:2 * E].T + b[E:2 * E]
    v = hidden_states @ w[2 * E:].T + b[2 * E:]
    q = q.reshape(B, 1, H, dh).transpose(0, 2, 1, 3)
    k = k.reshape(B, S, H, dh).transpose(0, 2, 1, 3)
    v = v.reshape(B, S, H, dh).transpose(0, 2, 1, 3)
    scores = jnp.einsum("bhqd,bhkd->bhqk", q, k) / (dh ** 0.5)
    attn = jax.nn.softmax(scores, axis=-1)
    out = jnp.einsum("bhqk,bhkd->bhqd", attn, v)
    out = out.transpose(0, 2, 1, 3).reshape(B, 1, E)
    out = out @ params["out_proj_weight"].T + params["out_proj_bias"]
    return out[:, 0, :]


def _make_params(key, E):
    k1, k2, k3, k4, k5 = jax.random.split(key, 5)
    return {
        "in_proj_weight": jax.random.normal(k1, (3 * E, E), jnp.float32) * 0.1,
        "in_proj_bias": jax.random.normal(k2, (3 * E,), jnp.float32) * 0.1,
        "out_proj_weight": jax.random.normal(k3, (E, E), jnp.float32) * 0.1,
        "out_proj_bias": jax.random.normal(k4, (E,), jnp.float32) * 0.1,
        "cls_token": jax.random.normal(k5, (1, 1, E), jnp.float32),
    }


if __name__ == "__main__":
    key = jax.random.PRNGKey(0)

    # 1) Small shape from the module spec.
    B, S, E, H = 2, 8, 32, 8
    kp, kx, key = jax.random.split(key, 3)
    params = _make_params(kp, E)
    hidden_states = jax.random.normal(kx, (B, S, E), jnp.float32)
    out = jax.block_until_ready(multihead_attention_pooling(hidden_states, params, H))
    ref = _reference(hidden_states, params, H)
    assert out.shape == (B, E)
    assert jnp.allclose(out, ref, atol=1e-4, rtol=1e-4), "mismatch vs reference (small)"

    # 2) Lane-dense shape exercising a multi-step, megacore-balanced grid.
    B2, S2, E2, H2 = 16, 16, 128, 8
    kp2, kx2 = jax.random.split(key, 2)
    params2 = _make_params(kp2, E2)
    hidden_states2 = jax.random.normal(kx2, (B2, S2, E2), jnp.float32)
    out2 = jax.block_until_ready(multihead_attention_pooling(hidden_states2, params2, H2))
    ref2 = _reference(hidden_states2, params2, H2)
    assert out2.shape == (B2, E2)
    assert jnp.allclose(out2, ref2, atol=1e-4, rtol=1e-4), "mismatch vs reference (dense)"

    print("KERNEL_OK")
</pallas_src>

<mosaic_0001>
module attributes {stable_mosaic.version = 11 : i64} {
  func.func @_mhap_kernel(%arg0: i32, %arg1: memref<2x8x32xf32, #tpu.memory_space<vmem>>, %arg2: memref<32x8xf32, #tpu.memory_space<vmem>>, %arg3: memref<32x32xf32, #tpu.memory_space<vmem>>, %arg4: memref<8x32xf32, #tpu.memory_space<vmem>>, %arg5: memref<32x32xf32, #tpu.memory_space<vmem>>, %arg6: memref<1x32xf32, #tpu.memory_space<vmem>>, %arg7: memref<2x32xf32, #tpu.memory_space<vmem>>) attributes {dimension_semantics = [#tpu.dimension_semantics<parallel>], iteration_bounds = array<i64: 1>, scalar_prefetch = 0 : i64, scratch_operands = 0 : i64, tpu.core_type = #tpu.core_type<tc>, window_params = [{transform_indices = @transform_0, window_bounds = array<i64: 2, 8, 32>}, {pipeline_mode = #tpu.pipeline_mode<synchronous>, transform_indices = @transform_1, window_bounds = array<i64: 32, 8>}, {pipeline_mode = #tpu.pipeline_mode<synchronous>, transform_indices = @transform_2, window_bounds = array<i64: 32, 32>}, {pipeline_mode = #tpu.pipeline_mode<synchronous>, transform_indices = @transform_3, window_bounds = array<i64: 8, 32>}, {pipeline_mode = #tpu.pipeline_mode<synchronous>, transform_indices = @transform_4, window_bounds = array<i64: 32, 32>}, {pipeline_mode = #tpu.pipeline_mode<synchronous>, transform_indices = @transform_5, window_bounds = array<i64: 1, 32>}, {transform_indices = @transform_6, window_bounds = array<i64: 2, 32>}]} {
    %c0 = arith.constant 0 : index
    %c0_0 = arith.constant 0 : index
    %c0_1 = arith.constant 0 : index
    %0 = vector.load %arg1[%c0, %c0_0, %c0_1] : memref<2x8x32xf32, #tpu.memory_space<vmem>>, vector<2x8x32xf32>
    %1 = vector.shape_cast %0 : vector<2x8x32xf32> to vector<16x32xf32>
    %c0_2 = arith.constant 0 : index
    %c0_3 = arith.constant 0 : index
    %2 = vector.load %arg2[%c0_2, %c0_3] : memref<32x8xf32, #tpu.memory_space<vmem>>, vector<32x8xf32>
    %cst = arith.constant dense<0.000000e+00> : vector<16x8xf32>
    %3 = tpu.matmul %1, %2, %cst {dimension_numbers = #tpu.dot_dimension_numbers<[1], [0], [0], [1], [0, 0, 1, 1], [], []>} : vector<16x32xf32>, vector<32x8xf32>, vector<16x8xf32> -> vector<16x8xf32>
    %4 = vector.shape_cast %3 : vector<16x8xf32> to vector<2x8x8xf32>
    %cst_4 = arith.constant dense<0xFF800000> : vector<2x8xf32>
    %5 = vector.multi_reduction <maximumf>, %4, %cst_4 [1] : vector<2x8x8xf32> to vector<2x8xf32>
    %6 = vector.shape_cast %5 : vector<2x8xf32> to vector<2x1x8xf32>
    %7 = vector.broadcast %6 : vector<2x1x8xf32> to vector<2x8x8xf32>
    %8 = arith.subf %4, %7 : vector<2x8x8xf32>
    %9 = math.exp %8 : vector<2x8x8xf32>
    %cst_5 = arith.constant dense<0.000000e+00> : vector<2x8xf32>
    %10 = vector.multi_reduction <add>, %9, %cst_5 [1] : vector<2x8x8xf32> to vector<2x8xf32>
    %11 = vector.shape_cast %10 : vector<2x8xf32> to vector<2x1x8xf32>
    %12 = tpu.reciprocal %11 : vector<2x1x8xf32> -> vector<2x1x8xf32>
    %13 = vector.broadcast %12 : vector<2x1x8xf32> to vector<2x8x8xf32>
    %14 = arith.mulf %9, %13 : vector<2x8x8xf32>
    "tpu.trace_start"() <{level = 10 : i32, message = "bsh,bse->bhe"}> : () -> ()
    %cst_6 = arith.constant dense<0.000000e+00> : vector<2x8x32xf32>
    %15 = tpu.matmul %14, %0, %cst_6 {dimension_numbers = #tpu.dot_dimension_numbers<[1], [1], [2], [2], [0, 0, 0, 2, 1, 2], [0], [0]>} : vector<2x8x8xf32>, vector<2x8x32xf32>, vector<2x8x32xf32> -> vector<2x8x32xf32>
    "tpu.trace_stop"() : () -> ()
    %16 = vector.shape_cast %15 : vector<2x8x32xf32> to vector<16x32xf32>
    %c0_7 = arith.constant 0 : index
    %c0_8 = arith.constant 0 : index
    %17 = vector.load %arg3[%c0_7, %c0_8] : memref<32x32xf32, #tpu.memory_space<vmem>>, vector<32x32xf32>
    %cst_9 = arith.constant dense<0.000000e+00> : vector<16x32xf32>
    %18 = tpu.matmul %16, %17, %cst_9 {dimension_numbers = #tpu.dot_dimension_numbers<[1], [0], [0], [1], [0, 0, 1, 1], [], []>} : vector<16x32xf32>, vector<32x32xf32>, vector<16x32xf32> -> vector<16x32xf32>
    %19 = vector.shape_cast %18 : vector<16x32xf32> to vector<2x8x32xf32>
    %c0_10 = arith.constant 0 : index
    %c0_11 = arith.constant 0 : index
    %20 = vector.load %arg4[%c0_10, %c0_11] : memref<8x32xf32, #tpu.memory_space<vmem>>, vector<8x32xf32>
    %21 = vector.shape_cast %20 : vector<8x32xf32> to vector<1x8x32xf32>
    %22 = vector.broadcast %21 : vector<1x8x32xf32> to vector<2x8x32xf32>
    %23 = arith.mulf %19, %22 : vector<2x8x32xf32>
    %cst_12 = arith.constant dense<0.000000e+00> : vector<2x32xf32>
    %24 = vector.multi_reduction <add>, %23, %cst_12 [1] : vector<2x8x32xf32> to vector<2x32xf32>
    %c0_13 = arith.constant 0 : index
    %c0_14 = arith.constant 0 : index
    %25 = vector.load %arg5[%c0_13, %c0_14] : memref<32x32xf32, #tpu.memory_space<vmem>>, vector<32x32xf32>
    %cst_15 = arith.constant dense<0.000000e+00> : vector<2x32xf32>
    %26 = tpu.matmul %24, %25, %cst_15 {dimension_numbers = #tpu.dot_dimension_numbers<[1], [0], [0], [1], [0, 0, 1, 1], [], []>} : vector<2x32xf32>, vector<32x32xf32>, vector<2x32xf32> -> vector<2x32xf32>
    %c0_16 = arith.constant 0 : index
    %c0_17 = arith.constant 0 : index
    %27 = vector.load %arg6[%c0_16, %c0_17] : memref<1x32xf32, #tpu.memory_space<vmem>>, vector<1x32xf32>
    %28 = vector.broadcast %27 : vector<1x32xf32> to vector<2x32xf32>
    %29 = arith.addf %26, %28 : vector<2x32xf32>
    %c0_18 = arith.constant 0 : index
    %c0_19 = arith.constant 0 : index
    %30 = vector.load %arg7[%c0_18, %c0_19] : memref<2x32xf32, #tpu.memory_space<vmem>>, vector<2x32xf32>
    tpu.vector_store %arg7[%c0_18, %c0_19], %29 {strides = array<i32>} : memref<2x32xf32, #tpu.memory_space<vmem>>, vector<2x32xf32>,
    return
  }
  func.func @transform_0(%arg0: i32) -> (i32, i32, i32) {
    %c0_i32 = arith.constant 0 : i32
    %c0_i32_0 = arith.constant 0 : i32
    %c0_i32_1 = arith.constant 0 : i32
    return %arg0, %c0_i32, %c0_i32_0 : i32, i32, i32
  }
  func.func @transform_1(%arg0: i32) -> (i32, i32) {
    %c0_i32 = arith.constant 0 : i32
    %c0_i32_0 = arith.constant 0 : i32
    %c0_i32_1 = arith.constant 0 : i32
    return %c0_i32, %c0_i32_0 : i32, i32
  }
  func.func @transform_2(%arg0: i32) -> (i32, i32) {
    %c0_i32 = arith.constant 0 : i32
    %c0_i32_0 = arith.constant 0 : i32
    %c0_i32_1 = arith.constant 0 : i32
    return %c0_i32, %c0_i32_0 : i32, i32
  }
  func.func @transform_3(%arg0: i32) -> (i32, i32) {
    %c0_i32 = arith.constant 0 : i32
    %c0_i32_0 = arith.constant 0 : i32
    %c0_i32_1 = arith.constant 0 : i32
    return %c0_i32, %c0_i32_0 : i32, i32
  }
  func.func @transform_4(%arg0: i32) -> (i32, i32) {
    %c0_i32 = arith.constant 0 : i32
    %c0_i32_0 = arith.constant 0 : i32
    %c0_i32_1 = arith.constant 0 : i32
    return %c0_i32, %c0_i32_0 : i32, i32
  }
  func.func @transform_5(%arg0: i32) -> (i32, i32) {
    %c0_i32 = arith.constant 0 : i32
    %c0_i32_0 = arith.constant 0 : i32
    %c0_i32_1 = arith.constant 0 : i32
    return %c0_i32, %c0_i32_0 : i32, i32
  }
  func.func @transform_6(%arg0: i32) -> (i32, i32) {
    %c0_i32 = arith.constant 0 : i32
    %c0_i32_0 = arith.constant 0 : i32
    return %arg0, %c0_i32 : i32, i32
  }
}

</mosaic_0001>

<bundles_post_ra>
// kernel: tpu_custom_call.1
= control target key start
LH: loop header
LB: loop body
LE: loop exit
PB: predicated region body
PF: predicated region fallthrough
CT: control target
= control target key end

     0   :  { %11 = vsyncpa [#allocation3], 0  ;;  %s563_s0 = inlined_call_operand.hbm [shape: f32[2,8,32], index: 0, kind: input, shape index: {}]   ;;  %s564_s1 = inlined_call_operand.vmem [shape: f32[32,8], index: 1, kind: input, shape index: {}]   ;;  %s565_s2 = inlined_call_operand.vmem [shape: f32[32,32], index: 2, kind: input, shape index: {}]   ;;  %s566_s3 = inlined_call_operand.vmem [shape: f32[8,32], index: 3, kind: input, shape index: {}]   ;;  %s567_s4 = inlined_call_operand.hbm [shape: f32[32,32], index: 4, kind: input, shape index: {}]   ;;  %s568_s5 = inlined_call_operand.vmem [shape: f32[1,32], index: 5, kind: input, shape index: {}]   ;;  %s569_s6 = inlined_call_operand.hbm [shape: f32[2,32], index: 6, kind: output, shape index: {}]  }
   0x1   :  { %12 = vsyncpa [#allocation6], 0 }
   0x2   :  { %13 = vsyncpa [#allocation4], 0  ;;  %s18_s23 = sshll.u32 %s563_s0, 4  ;;  %s471_s24 = smov [#allocation2]   ;;  %s19_s23 = int_to_ptr.hbm [resolvable:$true] %s18_s23 }
   0x3   :  { %s20_s25 = sshll.u32 %s471_s24, 4  ;;  %s37_s28 = sshll.u32 %s567_s4, 4  ;;  %s21_s25 = int_to_ptr.vmem [resolvable:$true] %s20_s25  ;;  %s38_s28 = int_to_ptr.hbm [resolvable:$true] %s37_s28 }
   0x4   :  { %s472_s29 = smov 128   ;;  %s473_s30 = smov 8  }
   0x5   :  { %26 = dma.hbm_to_vmem [thread:$0]  %s19_s23, 256, %s21_s25, [#allocation3], %s472_s29, %s472_s29, %s473_s30  }
   0x6   :  { %s474_s7 = smov [#allocation5]  }
   0x7   :  { %s39_s8 = sshll.u32 %s474_s7, 4  ;;  %s40_s8 = int_to_ptr.vmem [resolvable:$true] %s39_s8 }
   0x8   :  { %45 = dma.hbm_to_vmem [thread:$0]  %s38_s28, 512, %s40_s8, [#allocation6], %s472_s29, %s472_s29, %s473_s30  }
   0x9   :  { %465 = dma.done.wait [#allocation3], 256  }
   0xa   :  { %466 = vsyncadd [#allocation3], 4294967040 }
   0xb   :  { %467 = dma.done.wait [#allocation6], 512  }
   0xc   :  { %468 = vsyncadd [#allocation6], 4294966784  ;;  %v61_v0 = vld [vmem:[%s564_s1 + $0x18] sm:$0xff]  ;;  %v60_v1 = vld [vmem:[%s564_s1 + $0x10] sm:$0xff]  ;;  %vm62_vm0 = vcmask 261120   ;;  %vm92_vm1 = vcmask 64512  }
   0xd   :  { %81 = vmatpush.msra.mxu0 %v61_v0  ;;  %v56_v2 = vld [vmem:[#allocation2] sm:$0xff]  ;;  %v57_v3 = vld [vmem:[#allocation2 + $0x8] sm:$0xff]  ;;  %v270_v0 = vld [vmem:[%s565_s2 + $0x18] sm:$0xff]  ;;  %vm327_vm10 = vcmask 1041409   ;;  %s475_s24 = smov [#allocation7]   ;;  %s360_s28 = sshll.u32 %s569_s6, 4  ;;  %s361_s28 = int_to_ptr.hbm [resolvable:$true] %s360_s28 }
   0xe   :  { %v59_v4 = vld [vmem:[%s564_s1 + $0x8] sm:$0xff]  ;;  %207 = vmatpush.msra.mxu1 %v56_v2  ;;  %262 = vmatpush.msra.mxu2 %v57_v3  ;;  %v58_v5 = vld [vmem:[%s564_s1] sm:$0xff]  ;;  %s358_s25 = sshll.u32 %s475_s24, 4  ;;  %vm351_vm11 = vcmask 254976   ;;  %s359_s25 = int_to_ptr.vmem [resolvable:$true] %s358_s25 }
   0xf   :  { %82 = vmatpush.msra.mxu0 %v60_v1  ;;  %v269_v1 = vld [vmem:[%s565_s2 + $0x10] sm:$0xff]  ;;  %289 = vmatpush.msra.mxu3 %v270_v0 }
  0x11   :  { %83 = vmatpush.msra.mxu0 %v59_v4  ;;  %290 = vmatpush.msra.mxu3 %v269_v1 }
  0x13   :  { %84 = vmatpush.msra.mxu0 %v58_v5  ;;  %v267_v5 = vld [vmem:[%s565_s2] sm:$0xff] }
  0x14   :  { %371 = vmatmul.msk.f32.vlgmr.msra.gmra.mxu0 %vm62_vm0, %v56_v2  ;;  %v268_v2 = vld [vmem:[%s565_s2 + $0x8] sm:$0xff] }
  0x15   :  { %291 = vmatpush.msra.mxu3 %v268_v2 }
  0x17   :  { %292 = vmatpush.msra.mxu3 %v267_v5 }
  0x1c   :  { %372 = vmatmul.msk.f32.gmra.mxu0 %vm62_vm0, %v57_v3 }
  0x91   :  { %v86_v6 = vpop.f32.mrf.mxu0 }
  0x92   :  { %v93_v7 = vsel %vm92_vm1, %v86_v6, -inf }
  0x93   :  { %v94_v8 = vrot.slane %v93_v7, 4 }
  0x95   :  { %v95_v9 = vmax.f32 %v93_v7, %v94_v8  ;;  %v320_v8 = vld [vmem:[#allocation5 + $0x18] sm:$0xff] }
  0x96   :  { %343 = vmatpush.msrb.mxu1 %v320_v8 }
  0x97   :  { %v96_v10 = vrot.slane %v95_v9, 2 }
  0x99   :  { %v97_v11 = vmax.f32 %v95_v9, %v96_v10  ;;  %v89_v12 = vpop.f32.mrf.mxu0  ;;  %v319_v9 = vld [vmem:[#allocation5 + $0x10] sm:$0xff]  ;;  %v318_v10 = vld [vmem:[#allocation5 + $0x8] sm:$0xff] }
  0x9a   :  { %v100_v13 = vsel %vm92_vm1, %v89_v12, -inf  ;;  %344 = vmatpush.msrb.mxu1 %v319_v9 }
  0x9b   :  { %v98_v14 = vrot.slane %v97_v11, 1  ;;  %v101_v15 = vrot.slane %v100_v13, 4 }
  0x9c   :  { %345 = vmatpush.msrb.mxu1 %v318_v10 }
  0x9d   :  { %v99_v16 = vmax.f32 %v97_v11, %v98_v14  ;;  %v102_v17 = vmax.f32 %v100_v13, %v101_v15  ;;  %v317_v11 = vld [vmem:[#allocation5] sm:$0xff] }
  0x9e   :  { %346 = vmatpush.msrb.mxu1 %v317_v11 }
  0x9f   :  { %v107_v18 = vsub.f32 %v86_v6, %v99_v16  ;;  %v103_v19 = vrot.slane %v102_v17, 2 }
  0xa1   :  { %v109_v20 = vmul.f32 1.442695, %v107_v18  ;;  %v104_v21 = vmax.f32 %v102_v17, %v103_v19 }
  0xa3   :  { %385 = vpow2.f32 %v109_v20  ;;  %v105_v22 = vrot.slane %v104_v21, 1 }
  0xa5   :  { %v106_v23 = vmax.f32 %v104_v21, %v105_v22 }
  0xa7   :  { %v108_v24 = vsub.f32 %v89_v12, %v106_v23  ;;  %v300_v12 = vld [vmem:[%s566_s3] sm:$0xff] }
  0xa9   :  { %v386_v25 = vpop.eup %385  ;;  %v111_v26 = vmul.f32 1.442695, %v108_v24 }
  0xaa   :  { %v113_v27 = vsel %vm92_vm1, %v386_v25, 0.0 }
  0xab   :  { %v114_v28 = vrot.slane %v113_v27, 4  ;;  %387 = vpow2.f32 %v111_v26 }
  0xad   :  { %v115_v29 = vadd.f32 %v114_v28, %v113_v27 }
  0xaf   :  { %v116_v30 = vrot.slane %v115_v29, 2 }
  0xb1   :  { %v388_v31 = vpop.eup %387  ;;  %v117_v32 = vadd.f32 %v116_v30, %v115_v29 }
  0xb2   :  { %v120_v33 = vsel %vm92_vm1, %v388_v31, 0.0 }
  0xb3   :  { %v118_v34 = vrot.slane %v117_v32, 1  ;;  %v121_v35 = vrot.slane %v120_v33, 4 }
  0xb5   :  { %v119_v36 = vadd.f32 %v118_v34, %v117_v32  ;;  %v122_v37 = vadd.f32 %v121_v35, %v120_v33  ;;  %v384_v32 = vld [vmem:[%s568_s5] ss:$0 sm:$0xff] }
  0xb7   :  { %389 = vrcp.f32 %v119_v36  ;;  %v123_v38 = vrot.slane %v122_v37, 2  ;;  %v138_v45 = vand.u32 2147483648, %v119_v36  ;;  %v136_v47 = vand.u32 2147483647, %v119_v36 }
  0xb8   :  { %vm132_vm3 = vweird.f32 %v119_v36 }
  0xb9   :  { %v124_v39 = vadd.f32 %v123_v38, %v122_v37  ;;  %v139_v50 = vor.u32 1.1754944e-38, %v138_v45  ;;  %vm137_vm5 = vcmp.eq.f32.partialorder %v136_v47, 8.507059e+37 }
  0xbb   :  { %v125_v40 = vrot.slane %v124_v39, 1 }
  0xbd   :  { %v390_v41 = vpop.eup %389  ;;  %v126_v42 = vadd.f32 %v125_v40, %v124_v39 }
  0xbe   :  { %v128_v43 = vmul.f32 %v390_v41, %v119_v36  ;;  %vm133_vm2 = vweird.f32 %v390_v41 }
  0xbf   :  { %391 = vrcp.f32 %v126_v42  ;;  %vm134_vm4 = vmor %vm132_vm3, %vm133_vm2  ;;  %v152_v56 = vand.u32 2147483648, %v126_v42  ;;  %v150_v58 = vand.u32 2147483647, %v126_v42  ;;  %vm146_vm7 = vweird.f32 %v126_v42 }
  0xc0   :  { %v129_v44 = vsub.f32 1.0, %v128_v43 }
  0xc1   :  { %v153_v60 = vor.u32 1.1754944e-38, %v152_v56  ;;  %vm151_vm9 = vcmp.eq.f32.partialorder %v150_v58, 8.507059e+37 }
  0xc2   :  { %v130_v46 = vmul.f32 %v390_v41, %v129_v44 }
  0xc4   :  { %v131_v48 = vadd.f32 %v390_v41, %v130_v46 }
  0xc5   :  { %v392_v49 = vpop.eup %391 }
  0xc6   :  { %v135_v51 = vsel %vm134_vm4, %v390_v41, %v131_v48  ;;  %v142_v52 = vmul.f32 %v392_v49, %v126_v42  ;;  %vm147_vm6 = vweird.f32 %v392_v49 }
  0xc7   :  { %v140_v53 = vsel %vm137_vm5, %v139_v50, %v135_v51  ;;  %vm148_vm8 = vmor %vm146_vm7, %vm147_vm6 }
  0xc8   :  { %v155_v54 = vmul.f32 %v386_v25, %v140_v53  ;;  %v143_v55 = vsub.f32 1.0, %v142_v52 }
  0xca   :  { %157 = vxpose.xlu0.b32.start.end [1/1] (short) (narrow) %v155_v54, 8  ;;  %v144_v57 = vmul.f32 %v392_v49, %v143_v55 }
  0xcc   :  { %v145_v59 = vadd.f32 %v392_v49, %v144_v57 }
  0xce   :  { %v149_v61 = vsel %vm148_vm8, %v392_v49, %v145_v59 }
  0xcf   :  { %v154_v62 = vsel %vm151_vm9, %v153_v60, %v149_v61 }
  0xd0   :  { %v156_v63 = vmul.f32 %v388_v31, %v154_v62 }
  0xd2   :  { %212 = vxpose.xlu0.b32.start.end [1/1] (short) (narrow) %v156_v63, 8 }
 0x16e   :  { %v173_v3 = vpop.trf.xlu0 }
 0x16f   :  { %373 = vmatmul.msk.f32.vlgmr.msra.gmra.mxu1 %vm92_vm1, %v173_v3 }
 0x176   :  { %v228_v4 = vpop.trf.xlu0 }
 0x177   :  { %374 = vmatmul.msk.f32.vlgmr.msra.gmra.mxu2 %vm92_vm1, %v228_v4 }
 0x1ec   :  { %v209_v6 = vpop.f32.mrf.mxu1 }
 0x1ed   :  { %375 = vmatmul.msk.f32.vlgmr.msra.gmra.mxu3 %vm62_vm0, %v209_v6 }
 0x1fa   :  { %v264_v7 = vpop.f32.mrf.mxu2 }
 0x1fb   :  { %376 = vmatmul.msk.f32.gmra.mxu3 %vm62_vm0, %v264_v7 }
 0x270   :  { %v294_v13 = vpop.f32.mrf.mxu3 }
 0x271   :  { %v301_v14 = vmul.f32 %v300_v12, %v294_v13 }
 0x273   :  { %v303_v15 = vsel %vm62_vm0, %v301_v14, 0.0 }
 0x274   :  { %v304_v16 = vrot.slane %v303_v15, 4 }
 0x276   :  { %v305_v17 = vadd.f32 %v304_v16, %v303_v15 }
 0x278   :  { %v306_v20 = vrot.slane %v305_v17, 2 }
 0x27a   :  { %v307_v23 = vadd.f32 %v306_v20, %v305_v17 }
 0x27c   :  { %v308_v26 = vrot.slane %v307_v23, 1 }
 0x27e   :  { %v297_v18 = vpop.f32.mrf.mxu3  ;;  %v309_v29 = vadd.f32 %v308_v26, %v307_v23 }
 0x27f   :  { %v302_v19 = vmul.f32 %v300_v12, %v297_v18 }
 0x281   :  { %v310_v21 = vsel %vm62_vm0, %v302_v19, 0.0 }
 0x282   :  { %v311_v22 = vrot.slane %v310_v21, 4 }
 0x284   :  { %v312_v24 = vadd.f32 %v311_v22, %v310_v21 }
 0x286   :  { %v313_v25 = vrot.slane %v312_v24, 2 }
 0x288   :  { %v314_v27 = vadd.f32 %v313_v25, %v312_v24 }
 0x28a   :  { %v315_v28 = vrot.slane %v314_v27, 1 }
 0x28c   :  { %v316_v30 = vadd.f32 %v315_v28, %v314_v27 }
 0x28e   :  { %v328_v31 = vsel %vm327_vm10, %v316_v30, %v309_v29 }
 0x28f   :  { %377 = vmatmul.msk.f32.vlgmr.msrb.gmra.mxu1 %vm62_vm0, %v328_v31 }
 0x30c   :  { %v348_v33 = vpop.f32.mrf.mxu1 }
 0x30d   :  { %v349_v34 = vadd.f32 %v384_v32, %v348_v33 }
 0x30f   :  { %352 = vst.msk [vmem:[#allocation7] sm:$0x3] %vm351_vm11, %v349_v34 }
 0x310   :  { %363 = dma.vmem_to_hbm [thread:$0]  %s359_s25, 32, %s361_s28, [#allocation4]  }
 0x311   :  { %469 = dma.done.wait [#allocation4], 32  }
 0x312   :  { %470 = vsyncadd [#allocation4], 4294967264 }
 0x313   :  { %368 = vsyncpa [#allocation3], 1 }
 0x314   :  { %369 = vsyncpa [#allocation6], 1 }
 0x315   :  { %370 = vsyncpa [#allocation4], 1 }

</bundles_post_ra>
